<compile_context>
chip_gen: v7x
topology: tpu7x:2x2x1
jax: 0.10.0
libtpu: 0.0.40
codegen_flags: <defaults>
</compile_context>

<pallas_src>
import numpy as np
import jax
import jax.numpy as jnp
from jax.experimental import pallas as pl
from jax.experimental.pallas import tpu as pltpu

_LANE = 128
_SUBLANE = 16  # bf16 packs 2 rows/sublane; 16 keeps both f32 and bf16 tiles clean

# ----------------------------------------------------------------------------
# Deterministic basis construction (pure NumPy; no pywt / scipy required).
# ----------------------------------------------------------------------------
_SQRT3 = np.sqrt(3.0)
_DB_REC_LO = {
    # Daubechies reconstruction low-pass filters (pywt convention).
    "db2": np.array([1.0 + _SQRT3, 3.0 + _SQRT3, 3.0 - _SQRT3, 1.0 - _SQRT3])
    / (4.0 * np.sqrt(2.0)),
    "db3": np.array(
        [
            0.3326705529509569,
            0.8068915093133388,
            0.4598775021193313,
            -0.13501102001039084,
            -0.08544127388224149,
            0.035226291882100656,
        ]
    ),
}


def _wavefuns(wavelet_type="db3", level=10):
    # TODO(synk): pywt/scipy are unavailable in-script; phi/psi are synthesized
    # with a pure-NumPy cascade approximation of
    # pywt.Wavelet(wavelet_type).wavefun(level=10) + np.interp for interp1d.
    rec_lo = np.asarray(_DB_REC_LO[wavelet_type], dtype=np.float64)
    L = rec_lo.size
    rec_hi = np.array([(-1.0) ** n * rec_lo[L - 1 - n] for n in range(L)])

    def cascade(start):
        arr = np.sqrt(2.0) * np.asarray(start, dtype=np.float64)
        for _ in range(level - 1):
            up = np.zeros(2 * arr.size - 1, dtype=np.float64)
            up[::2] = arr
            arr = np.sqrt(2.0) * np.convolve(up, rec_lo)
        return arr

    phi = cascade(rec_lo)
    psi = cascade(rec_hi)
    x_phi = np.linspace(0.0, L - 1.0, phi.size)
    x_psi = np.linspace(0.0, L - 1.0, psi.size)
    return phi, psi, x_phi, x_psi


def make_wavelet_basis(basis_dim, wavelet_type="db3"):
    """Replicates _WaveletGenerator.__init__: square (basis_dim, basis_dim) W."""
    phi, psi, x_phi, x_psi = _wavefuns(wavelet_type)
    new_phi = np.interp(np.linspace(x_phi.min(), x_phi.max(), basis_dim), x_phi, phi)
    new_psi = np.interp(np.linspace(x_psi.min(), x_psi.max(), basis_dim), x_psi, psi)
    W = np.zeros((basis_dim, basis_dim), dtype=np.float64)
    half = basis_dim // 2
    for i in range(basis_dim):
        if i < half:
            W[:, i] = np.roll(new_phi, i)[:basis_dim]
        else:
            W[:, i] = np.roll(new_psi, i - half)[:basis_dim]
    return W.astype(np.float32)


def prepare_basis(W_f32, *, dtype=jnp.bfloat16):
    """One-time host-side pad + cast so no per-call pad ops are emitted.

    Pads the output (lane) dim up to a multiple of 128 for unmasked stores;
    the contraction dim K is left as-is (full-extent block is legal).
    Returns (device basis (K, Tp) in `dtype`, true target_length T).
    NOTE: casting W (and x, in-kernel) to bf16 is an intentional precision
    trade for 2-3x MXU throughput; results differ from pure-f32 at ~1e-2 rel.
    """
    K, T = W_f32.shape
    Tp = ((T + _LANE - 1) // _LANE) * _LANE
    W = np.asarray(W_f32)
    if Tp != T:
        W = np.pad(W, ((0, 0), (0, Tp - T)))
    return jnp.asarray(W, dtype=dtype), T


# ----------------------------------------------------------------------------
# Helpers
# ----------------------------------------------------------------------------
def _round_up(v, m):
    return ((v + m - 1) // m) * m


def _round_down(v, m):
    return (v // m) * m


def _vmem_cap_bytes():
    """Generation-aware usable VMEM budget (~20% headroom for compiler scratch)."""
    cap = None
    try:
        info = pltpu.get_tpu_info()
        cap = getattr(info, "vmem_capacity_bytes", None)
    except Exception:
        cap = None
    if not cap:
        cap = 64 * 1024 * 1024  # conservative default: v7x per-TensorCore VMEM
    return int(0.80 * cap)      # ~51 MiB on v7x, ~102 MiB on v5e/v6e


# ----------------------------------------------------------------------------
# Kernels
# ----------------------------------------------------------------------------
def _resident_matmul_kernel(x_ref, w_ref, o_ref):
    """out tile = cast(x tile) @ W, with W fully resident in VMEM.

    x is DMA'd in its native dtype (f32) and cast to the basis dtype on the
    VPU right before the MXU dot (f32 accumulation). No K accumulator needed:
    full-K contraction per grid step writes straight to o_ref.
    """
    x = x_ref[...].astype(w_ref.dtype)
    o_ref[...] = jnp.dot(
        x, w_ref[...], preferred_element_type=jnp.float32
    ).astype(o_ref.dtype)


def _ktiled_matmul_kernel(x_ref, w_ref, o_ref, acc_ref):
    """Fallback when W is too big to pin: stream W over a trailing K axis."""
    @pl.when(pl.program_id(1) == 0)
    def _init():
        acc_ref[...] = jnp.zeros_like(acc_ref)

    x = x_ref[...].astype(w_ref.dtype)
    acc_ref[...] += jnp.dot(x, w_ref[...], preferred_element_type=jnp.float32)

    @pl.when(pl.program_id(1) == pl.num_programs(1) - 1)
    def _store():
        o_ref[...] = acc_ref[...].astype(o_ref.dtype)


# ----------------------------------------------------------------------------
# pallas_call builders
# ----------------------------------------------------------------------------
def _resident_call(x2, basis, tm, out_dtype, vmem_limit, single_buffer_basis):
    M, K = x2.shape
    _, Tp = basis.shape
    w_kwargs = {"pipeline_mode": pl.Buffered(1)} if single_buffer_basis else {}
    # TODO(synk): if profiling on v7x shows only one TensorCore active, switch
    # this axis to pltpu.CORE_PARALLEL (only helps when M >= 2*tm).
    return pl.pallas_call(
        _resident_matmul_kernel,
        out_shape=jax.ShapeDtypeStruct((M, Tp), out_dtype),
        grid_spec=pltpu.PrefetchScalarGridSpec(
            num_scalar_prefetch=0,
            grid=(pl.cdiv(M, tm),),                    # ragged last tile is masked
            in_specs=[
                pl.BlockSpec((tm, K), lambda i: (i, 0)),          # stream x rows
                pl.BlockSpec((K, Tp), lambda i: (0, 0), **w_kwargs),  # resident W
            ],
            out_specs=pl.BlockSpec((tm, Tp), lambda i: (i, 0)),
        ),
        compiler_params=pltpu.CompilerParams(
            dimension_semantics=("parallel",),
            vmem_limit_bytes=int(vmem_limit),
        ),
    )(x2, basis)


def _ktiled_call(x2, basis, tm, tk, out_dtype, vmem_limit):
    M, K = x2.shape
    _, Tp = basis.shape
    return pl.pallas_call(
        _ktiled_matmul_kernel,
        out_shape=jax.ShapeDtypeStruct((M, Tp), out_dtype),
        grid_spec=pltpu.PrefetchScalarGridSpec(
            num_scalar_prefetch=0,
            grid=(pl.cdiv(M, tm), K // tk),
            in_specs=[
                pl.BlockSpec((tm, tk), lambda i, k: (i, k)),
                pl.BlockSpec((tk, Tp), lambda i, k: (k, 0)),
            ],
            out_specs=pl.BlockSpec((tm, Tp), lambda i, k: (i, 0)),
            scratch_shapes=[pltpu.VMEM((tm, Tp), jnp.float32)],
        ),
        compiler_params=pltpu.CompilerParams(
            dimension_semantics=("parallel", "arbitrary"),
            vmem_limit_bytes=int(vmem_limit),
        ),
    )(x2, basis)


# ----------------------------------------------------------------------------
# Public wrapper
# ----------------------------------------------------------------------------
def wavelet_generator(x, basis_padded, target_length, *, tm_max=512,
                      out_dtype=jnp.float32, force_k_tiling=False, tk=None):
    """Forward of _WaveletGenerator: matmul(x, basis) via a Pallas TPU kernel.

    x: (..., N) array (any float dtype; cast to the basis dtype in-kernel).
    basis_padded: (N, Tp) from prepare_basis (bf16, lane-padded).
    out_dtype: jnp.float32 (default, matches the PyTorch module) or
      jnp.bfloat16 to halve output HBM traffic when the consumer tolerates it.
    """
    *lead, N = x.shape
    K, Tp = basis_padded.shape
    assert K == N, f"input feature dim {N} != basis dim {K}"

    x2 = x.reshape(-1, N)          # leading-dim collapse only; NO dtype cast here
    M = x2.shape[0]

    x_item = jnp.dtype(x2.dtype).itemsize
    w_item = jnp.dtype(basis_padded.dtype).itemsize
    o_item = jnp.dtype(out_dtype).itemsize

    vmem_cap = _vmem_cap_bytes()
    # Double-buffered streamed x / out blocks, per row of tm.
    stream_bytes_per_row = 2 * (K * x_item + Tp * o_item)

    def _plan_tm(fixed_bytes, bytes_per_row):
        rows = (vmem_cap - fixed_bytes) // bytes_per_row
        if rows < _SUBLANE:
            return None
        tm_hi = max(_SUBLANE,
                    min(_round_up(tm_max, _SUBLANE), _round_down(int(rows), _SUBLANE)))
        n_tiles = -(-M // tm_hi)
        # Balance tiles so the ragged last tile wastes as little as possible.
        return min(tm_hi, _round_up(-(-M // n_tiles), _SUBLANE))

    w_resident = K * Tp * w_item
    out = None

    if not force_k_tiling:
        tm = _plan_tm(w_resident, stream_bytes_per_row)     # single-buffered W
        if tm is not None:
            try:
                out = _resident_call(x2, basis_padded, tm, out_dtype, vmem_cap, True)
            except Exception:
                # pl.Buffered(1) not accepted by this JAX: fall back to the
                # default (double-buffered) pipeline for the resident basis.
                tm2 = _plan_tm(2 * w_resident, stream_bytes_per_row)
                if tm2 is not None:
                    out = _resident_call(x2, basis_padded, tm2, out_dtype,
                                         vmem_cap, False)

    if out is None:
        # K-tiled fallback: stream W in (tk, Tp) tiles with an f32 accumulator.
        if K % _LANE != 0:
            raise ValueError(
                f"basis too large to pin in VMEM and K={K} is not a multiple of "
                f"128; cannot tile the contraction dim safely")
        if tk is None:
            tk = next(t for t in (512, 384, 256, 128) if K % t == 0)
        if tk % _LANE != 0 or K % tk != 0:
            raise ValueError(f"tk={tk} must be a multiple of 128 dividing K={K}")
        fixed = 2 * tk * Tp * w_item                      # double-buffered W tiles
        per_row = 2 * (tk * x_item + Tp * o_item) + Tp * 4  # x/out blocks + acc
        tm = _plan_tm(fixed, per_row)
        if tm is None:
            raise ValueError("even the K-tiled path does not fit VMEM; "
                             "reduce Tp or tk")
        out = _ktiled_call(x2, basis_padded, tm, tk, out_dtype, vmem_cap)

    if Tp != target_length:
        # Only taken when basis_dim is not a multiple of 128; consider keeping
        # the padded slab and slicing at the consumer to avoid this copy.
        out = out[:, :target_length]
    return out.reshape(*lead, target_length)


# ----------------------------------------------------------------------------
# Demo / correctness check
# ----------------------------------------------------------------------------
if __name__ == "__main__":
    basis_dim = 256  # _WaveletGenerator(basis_dim): square basis, x @ W
    W = make_wavelet_basis(basis_dim, wavelet_type="db3")
    basis_padded, T = prepare_basis(W)

    key = jax.random.PRNGKey(0)
    x = jax.random.normal(key, (2, 8, basis_dim), dtype=jnp.float32)  # M = 16 rows

    y = wavelet_generator(x, basis_padded, T)
    y = jax.block_until_ready(y)
    assert y.shape == (2, 8, basis_dim)
    assert y.dtype == jnp.float32

    # Reference 1: identical bf16-input / f32-accumulate math in plain XLA.
    y_bf16_ref = jnp.matmul(
        x.astype(jnp.bfloat16),
        jnp.asarray(W, jnp.bfloat16),
        preferred_element_type=jnp.float32,
    )
    np.testing.assert_allclose(
        np.asarray(y), np.asarray(y_bf16_ref), rtol=1e-2, atol=1e-2
    )

    # Reference 2 (loose): full-f32 forward; bf16 input rounding dominates.
    y_f32_ref = jnp.matmul(x, jnp.asarray(W, jnp.float32))
    np.testing.assert_allclose(
        np.asarray(y), np.asarray(y_f32_ref), rtol=1e-1, atol=2.5e-1
    )

    # Also exercise the K-tiled fallback path (used when W cannot stay
    # resident in VMEM, e.g. very large basis_dim on v7x) and check it agrees.
    y_tiled = wavelet_generator(x, basis_padded, T, force_k_tiling=True, tk=128)
    y_tiled = jax.block_until_ready(y_tiled)
    np.testing.assert_allclose(
        np.asarray(y), np.asarray(y_tiled), rtol=1e-3, atol=1e-3
    )

    print("KERNEL_OK")
</pallas_src>

<mosaic_0001>
module attributes {stable_mosaic.version = 11 : i64} {
  func.func @_resident_matmul_kernel(%arg0: i32, %arg1: memref<16x256xf32, #tpu.memory_space<vmem>>, %arg2: memref<256x256xbf16, #tpu.memory_space<vmem>>, %arg3: memref<16x256xf32, #tpu.memory_space<vmem>>) attributes {dimension_semantics = [#tpu.dimension_semantics<parallel>], iteration_bounds = array<i64: 1>, scalar_prefetch = 0 : i64, scratch_operands = 0 : i64, tpu.core_type = #tpu.core_type<tc>, window_params = [{transform_indices = @transform_0, window_bounds = array<i64: 16, 256>}, {pipeline_mode = #tpu.pipeline_mode<synchronous>, transform_indices = @transform_1, window_bounds = array<i64: 256, 256>}, {transform_indices = @transform_2, window_bounds = array<i64: 16, 256>}]} {
    %c0 = arith.constant 0 : index
    %c0_0 = arith.constant 0 : index
    %0 = vector.load %arg1[%c0, %c0_0] : memref<16x256xf32, #tpu.memory_space<vmem>>, vector<16x256xf32>
    %1 = arith.truncf %0 : vector<16x256xf32> to vector<16x256xbf16>
    %c0_1 = arith.constant 0 : index
    %c0_2 = arith.constant 0 : index
    %2 = vector.load %arg2[%c0_1, %c0_2] : memref<256x256xbf16, #tpu.memory_space<vmem>>, vector<256x256xbf16>
    %cst = arith.constant dense<0.000000e+00> : vector<16x256xf32>
    %3 = tpu.matmul %1, %2, %cst {dimension_numbers = #tpu.dot_dimension_numbers<[1], [0], [0], [1], [0, 0, 1, 1], [], []>} : vector<16x256xbf16>, vector<256x256xbf16>, vector<16x256xf32> -> vector<16x256xf32>
    %c0_3 = arith.constant 0 : index
    %c0_4 = arith.constant 0 : index
    %4 = vector.load %arg3[%c0_3, %c0_4] : memref<16x256xf32, #tpu.memory_space<vmem>>, vector<16x256xf32>
    tpu.vector_store %arg3[%c0_3, %c0_4], %3 {strides = array<i32>} : memref<16x256xf32, #tpu.memory_space<vmem>>, vector<16x256xf32>,
    return
  }
  func.func @transform_0(%arg0: i32) -> (i32, i32) {
    %c0_i32 = arith.constant 0 : i32
    %c0_i32_0 = arith.constant 0 : i32
    return %arg0, %c0_i32 : i32, i32
  }
  func.func @transform_1(%arg0: i32) -> (i32, i32) {
    %c0_i32 = arith.constant 0 : i32
    %c0_i32_0 = arith.constant 0 : i32
    %c0_i32_1 = arith.constant 0 : i32
    return %c0_i32, %c0_i32_0 : i32, i32
  }
  func.func @transform_2(%arg0: i32) -> (i32, i32) {
    %c0_i32 = arith.constant 0 : i32
    %c0_i32_0 = arith.constant 0 : i32
    return %arg0, %c0_i32 : i32, i32
  }
}

module attributes {stable_mosaic.version = 11 : i64} {
  func.func @_resident_matmul_kernel(%arg0: i32, %arg1: memref<16x256xf32, #tpu.memory_space<vmem>>, %arg2: memref<256x256xbf16, #tpu.memory_space<vmem>>, %arg3: memref<16x256xf32, #tpu.memory_space<vmem>>) attributes {dimension_semantics = [#tpu.dimension_semantics<parallel>], iteration_bounds = array<i64: 1>, scalar_prefetch = 0 : i64, scratch_operands = 0 : i64, tpu.core_type = #tpu.core_type<tc>, window_params = [{transform_indices = @transform_0, window_bounds = array<i64: 16, 256>}, {pipeline_mode = #tpu.pipeline_mode<synchronous>, transform_indices = @transform_1, window_bounds = array<i64: 256, 256>}, {transform_indices = @transform_2, window_bounds = array<i64: 16, 256>}]} {
    %c0 = arith.constant 0 : index
    %c0_0 = arith.constant 0 : index
    %0 = vector.load %arg1[%c0, %c0_0] : memref<16x256xf32, #tpu.memory_space<vmem>>, vector<16x256xf32>
    %1 = arith.truncf %0 : vector<16x256xf32> to vector<16x256xbf16>
    %c0_1 = arith.constant 0 : index
    %c0_2 = arith.constant 0 : index
    %2 = vector.load %arg2[%c0_1, %c0_2] : memref<256x256xbf16, #tpu.memory_space<vmem>>, vector<256x256xbf16>
    %cst = arith.constant dense<0.000000e+00> : vector<16x256xf32>
    %3 = tpu.matmul %1, %2, %cst {dimension_numbers = #tpu.dot_dimension_numbers<[1], [0], [0], [1], [0, 0, 1, 1], [], []>} : vector<16x256xbf16>, vector<256x256xbf16>, vector<16x256xf32> -> vector<16x256xf32>
    %c0_3 = arith.constant 0 : index
    %c0_4 = arith.constant 0 : index
    %4 = vector.load %arg3[%c0_3, %c0_4] : memref<16x256xf32, #tpu.memory_space<vmem>>, vector<16x256xf32>
    tpu.vector_store %arg3[%c0_3, %c0_4], %3 {strides = array<i32>} : memref<16x256xf32, #tpu.memory_space<vmem>>, vector<16x256xf32>,
    return
  }
  func.func @transform_0(%arg0: i32) -> (i32, i32) {
    %c0_i32 = arith.constant 0 : i32
    %c0_i32_0 = arith.constant 0 : i32
    return %arg0, %c0_i32 : i32, i32
  }
  func.func @transform_1(%arg0: i32) -> (i32, i32) {
    %c0_i32 = arith.constant 0 : i32
    %c0_i32_0 = arith.constant 0 : i32
    %c0_i32_1 = arith.constant 0 : i32
    return %c0_i32, %c0_i32_0 : i32, i32
  }
  func.func @transform_2(%arg0: i32) -> (i32, i32) {
    %c0_i32 = arith.constant 0 : i32
    %c0_i32_0 = arith.constant 0 : i32
    return %arg0, %c0_i32 : i32, i32
  }
}

</mosaic_0001>

<bundles_post_ra>
// kernel: tpu_custom_call.1
= control target key start
LH: loop header
LB: loop body
LE: loop exit
PB: predicated region body
PF: predicated region fallthrough
CT: control target
= control target key end

     0   :  { %7 = vsyncpa [#allocation3], 0  ;;  %s526_s0 = inlined_call_operand.hbm [shape: f32[16,256], index: 0, kind: input, shape index: {}]   ;;  %s527_s1 = inlined_call_operand.hbm [shape: bf16[256,256], index: 1, kind: input, shape index: {}]   ;;  %s528_s2 = inlined_call_operand.hbm [shape: f32[16,256], index: 2, kind: output, shape index: {}]  }
   0x1   :  { %8 = vsyncpa [#allocation6], 0 }
   0x2   :  { %9 = vsyncpa [#allocation4], 0  ;;  %s462_s9 = smov [#allocation2]   ;;  %s390_s13 = scalar_lea.hbm %s526_s0, 512 }
   0x3   :  { %s15_s10 = sshll.u32 %s462_s9, 4  ;;  %p391_p0 = scmp.ne.s32.totalorder %s526_s0, %s390_s13  ;;  %s16_s10 = int_to_ptr.vmem [resolvable:$true] %s15_s10 }
   0x4   :  { %p394_p1 = scmp.lt.u32.totalorder %s390_s13, %s526_s0 }
   0x6   :  { %p396_p2 = pnand %p394_p1, %p391_p0 }
   0x8   :  { %399 = shalt.err (!%p396_p2)
}
   0x9   :  { %s400_s18 = scalar_lea.vmem %s16_s10, 512  ;;  %p405_p4 = scmp.lt.s32.totalorder %s16_s10, %s16_s10 }
   0xa   :  { %p401_p3 = scmp.ne.s32.totalorder %s16_s10, %s400_s18  ;;  %p406_p5 = scmp.lt.s32.totalorder %s400_s18, %s400_s18 }
   0xc   :  { %p407_p6 = por %p406_p5, %p405_p4 }
   0xe   :  { %p408_p7 = pnand %p407_p6, %p401_p3 }
  0x10   :  { %411 = shalt.err (!%p408_p7)
}
  0x11   :  { %s463_s19 = smov 256   ;;  %s464_s20 = smov 16  }
  0x12   :  { %21 = dma.hbm_to_vmem [thread:$0]  %s526_s0, 512, %s16_s10, [#allocation3], %s463_s19, %s463_s19, %s464_s20  }
  0x13   :  { %s465_s23 = smov [#allocation5]   ;;  %s412_s27 = scalar_lea.hbm %s527_s1, 4096 }
  0x14   :  { %s27_s24 = sshll.u32 %s465_s23, 4  ;;  %p413_p8 = scmp.ne.s32.totalorder %s527_s1, %s412_s27  ;;  %s28_s24 = int_to_ptr.vmem [resolvable:$true] %s27_s24 }
  0x15   :  { %p416_p9 = scmp.lt.u32.totalorder %s412_s27, %s527_s1 }
  0x17   :  { %p418_p10 = pnand %p416_p9, %p413_p8 }
  0x19   :  { %421 = shalt.err (!%p418_p10)
}
  0x1a   :  { %s422_s4 = scalar_lea.vmem %s28_s24, 4096  ;;  %p427_p12 = scmp.lt.s32.totalorder %s28_s24, %s28_s24 }
  0x1b   :  { %p423_p11 = scmp.ne.s32.totalorder %s28_s24, %s422_s4  ;;  %p428_p13 = scmp.lt.s32.totalorder %s422_s4, %s422_s4 }
  0x1d   :  { %p429_p0 = por %p428_p13, %p427_p12 }
  0x1f   :  { %p430_p1 = pnand %p429_p0, %p423_p11 }
  0x21   :  { %433 = shalt.err (!%p430_p1)
}
  0x22   :  { %s466_s0 = smov 128   ;;  %s467_s5 = smov 8  }
  0x23   :  { %33 = dma.hbm_to_vmem [thread:$0]  %s527_s1, 4096, %s28_s24, [#allocation6], %s466_s0, %s466_s0, %s467_s5  }
  0x24   :  { %456 = dma.done.wait [#allocation3], 512  }
  0x25   :  { %457 = vsyncadd [#allocation3], 4294966784 }
  0x26   :  { %458 = dma.done.wait [#allocation6], 4096  }
  0x27   :  { %459 = vsyncadd [#allocation6], 4294963200  ;;  %v342_v0 = vld [vmem:[#allocation5 + $0x4] ss:$8 sps:$4 sm:$0xff]   ;;  %v344_v1 = vld [vmem:[#allocation5] ss:$8 sps:$4 sm:$0xff]  }
  0x28   :  { %238 = vmatprep.subr.bf16.mxu0 %v342_v0  ;;  %v345_v2 = vld [vmem:[#allocation5 + $0x14] ss:$8 sps:$4 sm:$0xff]   ;;  %v347_v3 = vld [vmem:[#allocation5 + $0x10] ss:$8 sps:$4 sm:$0xff]   ;;  %v348_v4 = vld [vmem:[#allocation5 + $0x24] ss:$8 sps:$4 sm:$0xff]  }
  0x29   :  { %239 = vmatpush1.bf16.msra.mxu0 %v344_v1  ;;  %v350_v5 = vld [vmem:[#allocation5 + $0x20] ss:$8 sps:$4 sm:$0xff]   ;;  %v351_v6 = vld [vmem:[#allocation5 + $0x34] ss:$8 sps:$4 sm:$0xff]   ;;  %v353_v7 = vld [vmem:[#allocation5 + $0x30] ss:$8 sps:$4 sm:$0xff]  }
  0x2a   :  { %240 = vmatprep.subr.bf16.mxu0 %v345_v2  ;;  %v354_v8 = vld [vmem:[#allocation5 + $0x44] ss:$8 sps:$4 sm:$0xff]   ;;  %v356_v9 = vld [vmem:[#allocation5 + $0x40] ss:$8 sps:$4 sm:$0xff]   ;;  %v357_v10 = vld [vmem:[#allocation5 + $0x54] ss:$8 sps:$4 sm:$0xff]  }
  0x2b   :  { %v359_v11 = vld [vmem:[#allocation5 + $0x50] ss:$8 sps:$4 sm:$0xff]   ;;  %v360_v12 = vld [vmem:[#allocation5 + $0x64] ss:$8 sps:$4 sm:$0xff]   ;;  %v362_v16 = vld [vmem:[#allocation5 + $0x60] ss:$8 sps:$4 sm:$0xff]  }
  0x2c   :  { %v41_v13 = vld [vmem:[#allocation2 + $0x8] sm:$0xff]  ;;  %v43_v14 = vld [vmem:[#allocation2 + $0x18] sm:$0xff]  ;;  %v40_v35 = vld [vmem:[#allocation2] sm:$0xff]  ;;  %s468_s1 = smov [#allocation7]  }
  0x2d   :  { %241 = vmatpush1.bf16.msra.mxu0 %v347_v3  ;;  %v45_v15 = vpack.c.bf16 %v43_v14, %v41_v13  ;;  %v363_v17 = vld [vmem:[#allocation5 + $0x74] ss:$8 sps:$4 sm:$0xff]   ;;  %v365_v18 = vld [vmem:[#allocation5 + $0x70] ss:$8 sps:$4 sm:$0xff]   ;;  %v366_v19 = vld [vmem:[#allocation5 + $0x84] ss:$8 sps:$4 sm:$0xff]  }
  0x2e   :  { %242 = vmatprep.subr.bf16.mxu0 %v348_v4  ;;  %v368_v20 = vld [vmem:[#allocation5 + $0x80] ss:$8 sps:$4 sm:$0xff]   ;;  %v369_v21 = vld [vmem:[#allocation5 + $0x94] ss:$8 sps:$4 sm:$0xff]   ;;  %v371_v22 = vld [vmem:[#allocation5 + $0x90] ss:$8 sps:$4 sm:$0xff]  }
  0x2f   :  { %270 = vmatprep.mubr.bf16.mxu0 %v45_v15  ;;  %v372_v23 = vld [vmem:[#allocation5 + $0xa4] ss:$8 sps:$4 sm:$0xff]   ;;  %v374_v24 = vld [vmem:[#allocation5 + $0xa0] ss:$8 sps:$4 sm:$0xff]   ;;  %v375_v25 = vld [vmem:[#allocation5 + $0xb4] ss:$8 sps:$4 sm:$0xff]  }
  0x30   :  { %v377_v26 = vld [vmem:[#allocation5 + $0xb0] ss:$8 sps:$4 sm:$0xff]   ;;  %v378_v27 = vld [vmem:[#allocation5 + $0xc4] ss:$8 sps:$4 sm:$0xff]   ;;  %v380_v28 = vld [vmem:[#allocation5 + $0xc0] ss:$8 sps:$4 sm:$0xff]  }
  0x31   :  { %243 = vmatpush1.bf16.msra.mxu0 %v350_v5  ;;  %v381_v29 = vld [vmem:[#allocation5 + $0xd4] ss:$8 sps:$4 sm:$0xff]   ;;  %v383_v30 = vld [vmem:[#allocation5 + $0xd0] ss:$8 sps:$4 sm:$0xff]   ;;  %v384_v31 = vld [vmem:[#allocation5 + $0xe4] ss:$8 sps:$4 sm:$0xff]  }
  0x32   :  { %244 = vmatprep.subr.bf16.mxu0 %v351_v6  ;;  %v386_v32 = vld [vmem:[#allocation5 + $0xe0] ss:$8 sps:$4 sm:$0xff]   ;;  %v387_v33 = vld [vmem:[#allocation5 + $0xf4] ss:$8 sps:$4 sm:$0xff]   ;;  %v389_v34 = vld [vmem:[#allocation5 + $0xf0] ss:$8 sps:$4 sm:$0xff]  }
  0x33   :  { %v42_v36 = vld [vmem:[#allocation2 + $0x10] sm:$0xff]  ;;  %s290_s8 = sshll.u32 %s468_s1, 4  ;;  %s291_s8 = int_to_ptr.vmem [resolvable:$true] %s290_s8 }
  0x34   :  { %v44_v37 = vpack.c.bf16 %v42_v36, %v40_v35  ;;  %s434_s9 = scalar_lea.vmem %s291_s8, 512  ;;  %p439_p3 = scmp.lt.s32.totalorder %s291_s8, %s291_s8 }
  0x35   :  { %245 = vmatpush1.bf16.msra.mxu0 %v353_v7  ;;  %p435_p2 = scmp.ne.s32.totalorder %s291_s8, %s434_s9  ;;  %p440_p4 = scmp.lt.s32.totalorder %s434_s9, %s434_s9 }
  0x36   :  { %246 = vmatprep.subr.bf16.mxu0 %v354_v8 }
  0x37   :  { %p441_p5 = por %p440_p4, %p439_p3 }
  0x39   :  { %247 = vmatpush1.bf16.msra.mxu0 %v356_v9  ;;  %p442_p6 = pnand %p441_p5, %p435_p2 }
  0x3a   :  { %248 = vmatprep.subr.bf16.mxu0 %v357_v10 }
  0x3d   :  { %249 = vmatpush1.bf16.msra.mxu0 %v359_v11 }
  0x3e   :  { %250 = vmatprep.subr.bf16.mxu0 %v360_v12 }
  0x41   :  { %251 = vmatpush1.bf16.msra.mxu0 %v362_v16 }
  0x42   :  { %252 = vmatprep.subr.bf16.mxu0 %v363_v17 }
  0x45   :  { %253 = vmatpush1.bf16.msra.mxu0 %v365_v18 }
  0x46   :  { %254 = vmatprep.subr.bf16.mxu0 %v366_v19 }
  0x49   :  { %255 = vmatpush1.bf16.msra.mxu0 %v368_v20 }
  0x4a   :  { %256 = vmatprep.subr.bf16.mxu0 %v369_v21 }
  0x4d   :  { %257 = vmatpush1.bf16.msra.mxu0 %v371_v22 }
  0x4e   :  { %258 = vmatprep.subr.bf16.mxu0 %v372_v23 }
  0x51   :  { %259 = vmatpush1.bf16.msra.mxu0 %v374_v24 }
  0x52   :  { %260 = vmatprep.subr.bf16.mxu0 %v375_v25 }
  0x55   :  { %261 = vmatpush1.bf16.msra.mxu0 %v377_v26 }
  0x56   :  { %262 = vmatprep.subr.bf16.mxu0 %v378_v27 }
  0x59   :  { %263 = vmatpush1.bf16.msra.mxu0 %v380_v28 }
  0x5a   :  { %264 = vmatprep.subr.bf16.mxu0 %v381_v29 }
  0x5d   :  { %265 = vmatpush1.bf16.msra.mxu0 %v383_v30 }
  0x5e   :  { %266 = vmatprep.subr.bf16.mxu0 %v384_v31 }
  0x61   :  { %267 = vmatpush1.bf16.msra.mxu0 %v386_v32 }
  0x62   :  { %268 = vmatprep.subr.bf16.mxu0 %v387_v33 }
  0x65   :  { %269 = vmatpush1.bf16.msra.mxu0 %v389_v34 }
  0x68   :  { %271 = vmatmul.mubr.bf16.vlgmr.msra.gmra.mrb[0].mxu0 %v44_v37 }
 0x13b   :  { %v272_v38 = vpop.f32.mrb[0].mxu0 }
 0x13c   :  { %281 = vst [vmem:[#allocation7] sm:$0xff] %v272_v38  ;;  %v274_v39 = vpop.f32.mrb[1].mxu0 }
 0x13d   :  { %282 = vst [vmem:[#allocation7 + $0x8] sm:$0xff] %v274_v39  ;;  %v276_v40 = vpop.f32.mrb[2].mxu0 }
 0x13e   :  { %283 = vst [vmem:[#allocation7 + $0x10] sm:$0xff] %v276_v40  ;;  %v278_v41 = vpop.f32.mrb[3].mxu0 }
 0x13f   :  { %284 = vst [vmem:[#allocation7 + $0x18] sm:$0xff] %v278_v41 }
 0x140   :  { %445 = shalt.err (!%p442_p6)
}
 0x141   :  { %s446_s12 = scalar_lea.hbm %s528_s2, 512 }
 0x142   :  { %p447_p7 = scmp.ne.s32.totalorder %s528_s2, %s446_s12  ;;  %p450_p8 = scmp.lt.u32.totalorder %s446_s12, %s528_s2 }
 0x144   :  { %p452_p9 = pnand %p450_p8, %p447_p7 }
 0x146   :  { %455 = shalt.err (!%p452_p9)
}
 0x147   :  { %296 = dma.vmem_to_hbm [thread:$0]  %s291_s8, 512, %s528_s2, [#allocation4], %s463_s19, %s463_s19, %s464_s20  }
 0x148   :  { %460 = dma.done.wait [#allocation4], 512  }
 0x149   :  { %461 = vsyncadd [#allocation4], 4294966784 }
 0x14a   :  { %300 = vsyncpa [#allocation3], 1 }
 0x14b   :  { %301 = vsyncpa [#allocation6], 1 }
 0x14c   :  { %302 = vsyncpa [#allocation4], 1 }

// kernel: tpu_custom_call.1
= control target key start
LH: loop header
LB: loop body
LE: loop exit
PB: predicated region body
PF: predicated region fallthrough
CT: control target
= control target key end

     0   :  { %7 = vsyncpa [#allocation3], 0  ;;  %s526_s0 = inlined_call_operand.hbm [shape: f32[16,256], index: 0, kind: input, shape index: {}]   ;;  %s527_s1 = inlined_call_operand.hbm [shape: bf16[256,256], index: 1, kind: input, shape index: {}]   ;;  %s528_s2 = inlined_call_operand.hbm [shape: f32[16,256], index: 2, kind: output, shape index: {}]  }
   0x1   :  { %8 = vsyncpa [#allocation6], 0 }
   0x2   :  { %9 = vsyncpa [#allocation4], 0  ;;  %s462_s9 = smov [#allocation2]   ;;  %s390_s13 = scalar_lea.hbm %s526_s0, 512 }
   0x3   :  { %s15_s10 = sshll.u32 %s462_s9, 4  ;;  %p391_p0 = scmp.ne.s32.totalorder %s526_s0, %s390_s13  ;;  %s16_s10 = int_to_ptr.vmem [resolvable:$true] %s15_s10 }
   0x4   :  { %p394_p1 = scmp.lt.u32.totalorder %s390_s13, %s526_s0 }
   0x6   :  { %p396_p2 = pnand %p394_p1, %p391_p0 }
   0x8   :  { %399 = shalt.err (!%p396_p2)
}
   0x9   :  { %s400_s18 = scalar_lea.vmem %s16_s10, 512  ;;  %p405_p4 = scmp.lt.s32.totalorder %s16_s10, %s16_s10 }
   0xa   :  { %p401_p3 = scmp.ne.s32.totalorder %s16_s10, %s400_s18  ;;  %p406_p5 = scmp.lt.s32.totalorder %s400_s18, %s400_s18 }
   0xc   :  { %p407_p6 = por %p406_p5, %p405_p4 }
   0xe   :  { %p408_p7 = pnand %p407_p6, %p401_p3 }
  0x10   :  { %411 = shalt.err (!%p408_p7)
}
  0x11   :  { %s463_s19 = smov 256   ;;  %s464_s20 = smov 16  }
  0x12   :  { %21 = dma.hbm_to_vmem [thread:$0]  %s526_s0, 512, %s16_s10, [#allocation3], %s463_s19, %s463_s19, %s464_s20  }
  0x13   :  { %s465_s23 = smov [#allocation5]   ;;  %s412_s27 = scalar_lea.hbm %s527_s1, 4096 }
  0x14   :  { %s27_s24 = sshll.u32 %s465_s23, 4  ;;  %p413_p8 = scmp.ne.s32.totalorder %s527_s1, %s412_s27  ;;  %s28_s24 = int_to_ptr.vmem [resolvable:$true] %s27_s24 }
  0x15   :  { %p416_p9 = scmp.lt.u32.totalorder %s412_s27, %s527_s1 }
  0x17   :  { %p418_p10 = pnand %p416_p9, %p413_p8 }
  0x19   :  { %421 = shalt.err (!%p418_p10)
}
  0x1a   :  { %s422_s4 = scalar_lea.vmem %s28_s24, 4096  ;;  %p427_p12 = scmp.lt.s32.totalorder %s28_s24, %s28_s24 }
  0x1b   :  { %p423_p11 = scmp.ne.s32.totalorder %s28_s24, %s422_s4  ;;  %p428_p13 = scmp.lt.s32.totalorder %s422_s4, %s422_s4 }
  0x1d   :  { %p429_p0 = por %p428_p13, %p427_p12 }
  0x1f   :  { %p430_p1 = pnand %p429_p0, %p423_p11 }
  0x21   :  { %433 = shalt.err (!%p430_p1)
}
  0x22   :  { %s466_s0 = smov 128   ;;  %s467_s5 = smov 8  }
  0x23   :  { %33 = dma.hbm_to_vmem [thread:$0]  %s527_s1, 4096, %s28_s24, [#allocation6], %s466_s0, %s466_s0, %s467_s5  }
  0x24   :  { %456 = dma.done.wait [#allocation3], 512  }
  0x25   :  { %457 = vsyncadd [#allocation3], 4294966784 }
  0x26   :  { %458 = dma.done.wait [#allocation6], 4096  }
  0x27   :  { %459 = vsyncadd [#allocation6], 4294963200  ;;  %v342_v0 = vld [vmem:[#allocation5 + $0x4] ss:$8 sps:$4 sm:$0xff]   ;;  %v344_v1 = vld [vmem:[#allocation5] ss:$8 sps:$4 sm:$0xff]  }
  0x28   :  { %238 = vmatprep.subr.bf16.mxu0 %v342_v0  ;;  %v345_v2 = vld [vmem:[#allocation5 + $0x14] ss:$8 sps:$4 sm:$0xff]   ;;  %v347_v3 = vld [vmem:[#allocation5 + $0x10] ss:$8 sps:$4 sm:$0xff]   ;;  %v348_v4 = vld [vmem:[#allocation5 + $0x24] ss:$8 sps:$4 sm:$0xff]  }
  0x29   :  { %239 = vmatpush1.bf16.msra.mxu0 %v344_v1  ;;  %v350_v5 = vld [vmem:[#allocation5 + $0x20] ss:$8 sps:$4 sm:$0xff]   ;;  %v351_v6 = vld [vmem:[#allocation5 + $0x34] ss:$8 sps:$4 sm:$0xff]   ;;  %v353_v7 = vld [vmem:[#allocation5 + $0x30] ss:$8 sps:$4 sm:$0xff]  }
  0x2a   :  { %240 = vmatprep.subr.bf16.mxu0 %v345_v2  ;;  %v354_v8 = vld [vmem:[#allocation5 + $0x44] ss:$8 sps:$4 sm:$0xff]   ;;  %v356_v9 = vld [vmem:[#allocation5 + $0x40] ss:$8 sps:$4 sm:$0xff]   ;;  %v357_v10 = vld [vmem:[#allocation5 + $0x54] ss:$8 sps:$4 sm:$0xff]  }
  0x2b   :  { %v359_v11 = vld [vmem:[#allocation5 + $0x50] ss:$8 sps:$4 sm:$0xff]   ;;  %v360_v12 = vld [vmem:[#allocation5 + $0x64] ss:$8 sps:$4 sm:$0xff]   ;;  %v362_v16 = vld [vmem:[#allocation5 + $0x60] ss:$8 sps:$4 sm:$0xff]  }
  0x2c   :  { %v41_v13 = vld [vmem:[#allocation2 + $0x8] sm:$0xff]  ;;  %v43_v14 = vld [vmem:[#allocation2 + $0x18] sm:$0xff]  ;;  %v40_v35 = vld [vmem:[#allocation2] sm:$0xff]  ;;  %s468_s1 = smov [#allocation7]  }
  0x2d   :  { %241 = vmatpush1.bf16.msra.mxu0 %v347_v3  ;;  %v45_v15 = vpack.c.bf16 %v43_v14, %v41_v13  ;;  %v363_v17 = vld [vmem:[#allocation5 + $0x74] ss:$8 sps:$4 sm:$0xff]   ;;  %v365_v18 = vld [vmem:[#allocation5 + $0x70] ss:$8 sps:$4 sm:$0xff]   ;;  %v366_v19 = vld [vmem:[#allocation5 + $0x84] ss:$8 sps:$4 sm:$0xff]  }
  0x2e   :  { %242 = vmatprep.subr.bf16.mxu0 %v348_v4  ;;  %v368_v20 = vld [vmem:[#allocation5 + $0x80] ss:$8 sps:$4 sm:$0xff]   ;;  %v369_v21 = vld [vmem:[#allocation5 + $0x94] ss:$8 sps:$4 sm:$0xff]   ;;  %v371_v22 = vld [vmem:[#allocation5 + $0x90] ss:$8 sps:$4 sm:$0xff]  }
  0x2f   :  { %270 = vmatprep.mubr.bf16.mxu0 %v45_v15  ;;  %v372_v23 = vld [vmem:[#allocation5 + $0xa4] ss:$8 sps:$4 sm:$0xff]   ;;  %v374_v24 = vld [vmem:[#allocation5 + $0xa0] ss:$8 sps:$4 sm:$0xff]   ;;  %v375_v25 = vld [vmem:[#allocation5 + $0xb4] ss:$8 sps:$4 sm:$0xff]  }
  0x30   :  { %v377_v26 = vld [vmem:[#allocation5 + $0xb0] ss:$8 sps:$4 sm:$0xff]   ;;  %v378_v27 = vld [vmem:[#allocation5 + $0xc4] ss:$8 sps:$4 sm:$0xff]   ;;  %v380_v28 = vld [vmem:[#allocation5 + $0xc0] ss:$8 sps:$4 sm:$0xff]  }
  0x31   :  { %243 = vmatpush1.bf16.msra.mxu0 %v350_v5  ;;  %v381_v29 = vld [vmem:[#allocation5 + $0xd4] ss:$8 sps:$4 sm:$0xff]   ;;  %v383_v30 = vld [vmem:[#allocation5 + $0xd0] ss:$8 sps:$4 sm:$0xff]   ;;  %v384_v31 = vld [vmem:[#allocation5 + $0xe4] ss:$8 sps:$4 sm:$0xff]  }
  0x32   :  { %244 = vmatprep.subr.bf16.mxu0 %v351_v6  ;;  %v386_v32 = vld [vmem:[#allocation5 + $0xe0] ss:$8 sps:$4 sm:$0xff]   ;;  %v387_v33 = vld [vmem:[#allocation5 + $0xf4] ss:$8 sps:$4 sm:$0xff]   ;;  %v389_v34 = vld [vmem:[#allocation5 + $0xf0] ss:$8 sps:$4 sm:$0xff]  }
  0x33   :  { %v42_v36 = vld [vmem:[#allocation2 + $0x10] sm:$0xff]  ;;  %s290_s8 = sshll.u32 %s468_s1, 4  ;;  %s291_s8 = int_to_ptr.vmem [resolvable:$true] %s290_s8 }
  0x34   :  { %v44_v37 = vpack.c.bf16 %v42_v36, %v40_v35  ;;  %s434_s9 = scalar_lea.vmem %s291_s8, 512  ;;  %p439_p3 = scmp.lt.s32.totalorder %s291_s8, %s291_s8 }
  0x35   :  { %245 = vmatpush1.bf16.msra.mxu0 %v353_v7  ;;  %p435_p2 = scmp.ne.s32.totalorder %s291_s8, %s434_s9  ;;  %p440_p4 = scmp.lt.s32.totalorder %s434_s9, %s434_s9 }
  0x36   :  { %246 = vmatprep.subr.bf16.mxu0 %v354_v8 }
  0x37   :  { %p441_p5 = por %p440_p4, %p439_p3 }
  0x39   :  { %247 = vmatpush1.bf16.msra.mxu0 %v356_v9  ;;  %p442_p6 = pnand %p441_p5, %p435_p2 }
  0x3a   :  { %248 = vmatprep.subr.bf16.mxu0 %v357_v10 }
  0x3d   :  { %249 = vmatpush1.bf16.msra.mxu0 %v359_v11 }
  0x3e   :  { %250 = vmatprep.subr.bf16.mxu0 %v360_v12 }
  0x41   :  { %251 = vmatpush1.bf16.msra.mxu0 %v362_v16 }
  0x42   :  { %252 = vmatprep.subr.bf16.mxu0 %v363_v17 }
  0x45   :  { %253 = vmatpush1.bf16.msra.mxu0 %v365_v18 }
  0x46   :  { %254 = vmatprep.subr.bf16.mxu0 %v366_v19 }
  0x49   :  { %255 = vmatpush1.bf16.msra.mxu0 %v368_v20 }
  0x4a   :  { %256 = vmatprep.subr.bf16.mxu0 %v369_v21 }
  0x4d   :  { %257 = vmatpush1.bf16.msra.mxu0 %v371_v22 }
  0x4e   :  { %258 = vmatprep.subr.bf16.mxu0 %v372_v23 }
  0x51   :  { %259 = vmatpush1.bf16.msra.mxu0 %v374_v24 }
  0x52   :  { %260 = vmatprep.subr.bf16.mxu0 %v375_v25 }
  0x55   :  { %261 = vmatpush1.bf16.msra.mxu0 %v377_v26 }
  0x56   :  { %262 = vmatprep.subr.bf16.mxu0 %v378_v27 }
  0x59   :  { %263 = vmatpush1.bf16.msra.mxu0 %v380_v28 }
  0x5a   :  { %264 = vmatprep.subr.bf16.mxu0 %v381_v29 }
  0x5d   :  { %265 = vmatpush1.bf16.msra.mxu0 %v383_v30 }
  0x5e   :  { %266 = vmatprep.subr.bf16.mxu0 %v384_v31 }
  0x61   :  { %267 = vmatpush1.bf16.msra.mxu0 %v386_v32 }
  0x62   :  { %268 = vmatprep.subr.bf16.mxu0 %v387_v33 }
  0x65   :  { %269 = vmatpush1.bf16.msra.mxu0 %v389_v34 }
  0x68   :  { %271 = vmatmul.mubr.bf16.vlgmr.msra.gmra.mrb[0].mxu0 %v44_v37 }
 0x13b   :  { %v272_v38 = vpop.f32.mrb[0].mxu0 }
 0x13c   :  { %281 = vst [vmem:[#allocation7] sm:$0xff] %v272_v38  ;;  %v274_v39 = vpop.f32.mrb[1].mxu0 }
 0x13d   :  { %282 = vst [vmem:[#allocation7 + $0x8] sm:$0xff] %v274_v39  ;;  %v276_v40 = vpop.f32.mrb[2].mxu0 }
 0x13e   :  { %283 = vst [vmem:[#allocation7 + $0x10] sm:$0xff] %v276_v40  ;;  %v278_v41 = vpop.f32.mrb[3].mxu0 }
 0x13f   :  { %284 = vst [vmem:[#allocation7 + $0x18] sm:$0xff] %v278_v41 }
 0x140   :  { %445 = shalt.err (!%p442_p6)
}
 0x141   :  { %s446_s12 = scalar_lea.hbm %s528_s2, 512 }
 0x142   :  { %p447_p7 = scmp.ne.s32.totalorder %s528_s2, %s446_s12  ;;  %p450_p8 = scmp.lt.u32.totalorder %s446_s12, %s528_s2 }
 0x144   :  { %p452_p9 = pnand %p450_p8, %p447_p7 }
 0x146   :  { %455 = shalt.err (!%p452_p9)
}
 0x147   :  { %296 = dma.vmem_to_hbm [thread:$0]  %s291_s8, 512, %s528_s2, [#allocation4], %s463_s19, %s463_s19, %s464_s20  }
 0x148   :  { %460 = dma.done.wait [#allocation4], 512  }
 0x149   :  { %461 = vsyncadd [#allocation4], 4294966784 }
 0x14a   :  { %300 = vsyncpa [#allocation3], 1 }
 0x14b   :  { %301 = vsyncpa [#allocation6], 1 }
 0x14c   :  { %302 = vsyncpa [#allocation4], 1 }

</bundles_post_ra>
